<compile_context>
chip_gen: v7x
topology: tpu7x:2x2x1
jax: 0.10.0
libtpu: 0.0.40
codegen_flags: <defaults>
</compile_context>

<pallas_src>
import functools

import jax
import jax.numpy as jnp
from jax import lax
from jax.experimental import pallas as pl
from jax.experimental.pallas import tpu as pltpu


def _round_up(x, m):
    return (x + m - 1) // m * m


def _cbm_skip_head_kernel(x_ref, wa_ref, ba_ref, wi_ref, bi_ref,
                          wfh_ref, wfs_ref, bf_ref,
                          logits_ref, concepts_ref,
                          *, use_sigmoid, use_relu, hard):
    # Contract on the weights' second axis == x @ W.T without a transpose op.
    dn = (((1,), (1,)), ((), ()))

    f = jnp.maximum(x_ref[...].astype(jnp.float32), 0.0)   # relu(base output)
    # TODO(synk): nn.Dropout is identity here (inference / eval mode).
    identity = f

    concepts = lax.dot_general(f.astype(wa_ref.dtype), wa_ref[...], dn,
                               preferred_element_type=jnp.float32)
    concepts = concepts + ba_ref[...]
    # Store early so the concepts writeback overlaps the remaining matmuls.
    concepts_ref[...] = concepts.astype(concepts_ref.dtype)

    if use_sigmoid:
        c = 1.0 / (1.0 + jnp.exp(-concepts))          # EUP exp + divide
    elif use_relu:
        c = jnp.maximum(concepts, 0.0)
    else:
        c = concepts
    if hard:
        c = jnp.round(c)                              # round-half-to-even == torch.round

    h = lax.dot_general(c.astype(wi_ref.dtype), wi_ref[...], dn,
                        preferred_element_type=jnp.float32)
    h = jnp.maximum(h + bi_ref[...], 0.0)

    # concat([h, identity]) @ Wf.T  ==  h @ Wf[:, :H].T + identity @ Wf[:, H:].T
    y = lax.dot_general(h.astype(wfh_ref.dtype), wfh_ref[...], dn,
                        preferred_element_type=jnp.float32)
    y = y + lax.dot_general(identity.astype(wfs_ref.dtype), wfs_ref[...], dn,
                            preferred_element_type=jnp.float32)
    y = y + bf_ref[...]
    logits_ref[...] = y.astype(logits_ref.dtype)


def prepare_params(w_attr, b_attr, w_int, b_int, w_fin, b_fin,
                   param_dtype=jnp.float32):
    """One-time (parameter-load-time) padding / splitting of PyTorch-layout
    Linear weights into lane-dense, kernel-ready arrays. Do NOT call per step.

    Set param_dtype=jnp.bfloat16 on v6e/v7x for bf16 MXU operands (accumulation
    and epilogue stay f32 inside the kernel).
    """
    n_attr, n_lin = w_attr.shape
    n_hidden = w_int.shape[0]
    n_classes = w_fin.shape[0]
    assert w_int.shape[1] == n_attr
    assert w_fin.shape[1] == n_hidden + n_lin

    L = _round_up(n_lin, 128)
    A = _round_up(n_attr, 128)
    H = _round_up(n_hidden, 128)
    C = _round_up(n_classes, 128)

    def pad2(w, r, c):
        w = jnp.asarray(w, jnp.float32)
        return jnp.pad(w, ((0, r - w.shape[0]), (0, c - w.shape[1])))

    def pad_bias(b, n):
        b = jnp.asarray(b, jnp.float32)
        return jnp.pad(b, (0, n - b.shape[0])).reshape(1, n)

    w_fin = jnp.asarray(w_fin, jnp.float32)
    return dict(
        wa=pad2(w_attr, A, L).astype(param_dtype),
        ba=pad_bias(b_attr, A),
        wi=pad2(w_int, H, A).astype(param_dtype),
        bi=pad_bias(b_int, H),
        wfh=pad2(w_fin[:, :n_hidden], C, H).astype(param_dtype),
        wfs=pad2(w_fin[:, n_hidden:], C, L).astype(param_dtype),
        bf=pad_bias(b_fin, C),
        dims=(n_lin, n_attr, n_hidden, n_classes, L, A, H, C),
    )


def cub_cbm_with_skip_head_forward(x, params, *, use_sigmoid=True,
                                   use_relu=False, hard=False, block_b=256):
    """Runs the CBM-with-skip head fully inside one Pallas kernel.

    Args:
      x:      (B, n_linear_output) float32 base-model features.
      params: output of prepare_params().
    Returns:
      (logits (B, n_classes), concepts (B, n_attr)), both float32.
    """
    n_lin, n_attr, n_hidden, n_classes, L, A, H, C = params["dims"]
    B = x.shape[0]
    assert x.shape[1] == n_lin

    # Batch tiling: whole (sublane-padded) batch in one block if small,
    # otherwise block_b-row tiles over a parallel grid.
    B8 = _round_up(B, 8)
    TB = min(block_b, B8)
    Bp = _round_up(B8, TB)

    x = jnp.asarray(x, jnp.float32)
    if Bp != B or L != n_lin:
        xp = jnp.pad(x, ((0, Bp - B), (0, L - n_lin)))
    else:
        xp = x

    grid = (Bp // TB,)
    resident = lambda shape: pl.BlockSpec(shape, lambda i: (0, 0))
    batched = lambda shape: pl.BlockSpec(shape, lambda i: (i, 0))

    flops = 2 * Bp * (L * A + A * H + H * C + L * C)
    bytes_accessed = 4 * (Bp * L + A * L + A + H * A + H + C * H + C * L + C
                          + Bp * C + Bp * A)

    kernel = functools.partial(_cbm_skip_head_kernel,
                               use_sigmoid=use_sigmoid,
                               use_relu=use_relu, hard=hard)

    logits_p, concepts_p = pl.pallas_call(
        kernel,
        out_shape=(jax.ShapeDtypeStruct((Bp, C), jnp.float32),
                   jax.ShapeDtypeStruct((Bp, A), jnp.float32)),
        grid=grid,
        in_specs=[batched((TB, L)),
                  resident((A, L)), resident((1, A)),
                  resident((H, A)), resident((1, H)),
                  resident((C, H)), resident((C, L)), resident((1, C))],
        out_specs=(batched((TB, C)), batched((TB, A))),
        compiler_params=pltpu.CompilerParams(
            dimension_semantics=("parallel",)),
        cost_estimate=pl.CostEstimate(
            flops=flops,
            transcendentals=Bp * A if use_sigmoid else 0,
            bytes_accessed=bytes_accessed),
    )(xp, params["wa"], params["ba"], params["wi"], params["bi"],
      params["wfh"], params["wfs"], params["bf"])

    return logits_p[:B, :n_classes], concepts_p[:B, :n_attr]


def _reference_head(x, w_attr, b_attr, w_int, b_int, w_fin, b_fin,
                    use_sigmoid=True, use_relu=False, hard=False):
    f = jnp.maximum(x, 0.0)
    identity = f
    concepts = f @ w_attr.T + b_attr
    if use_sigmoid:
        c = 1.0 / (1.0 + jnp.exp(-concepts))
    elif use_relu:
        c = jnp.maximum(concepts, 0.0)
    else:
        c = concepts
    if hard:
        c = jnp.round(c)
    h = jnp.maximum(c @ w_int.T + b_int, 0.0)
    cat = jnp.concatenate([h, identity], axis=1)
    logits = cat @ w_fin.T + b_fin
    return logits, concepts


if __name__ == "__main__":
    # TODO(synk): the ResNet18 base model is not translated; the kernel starts
    # from the base model's linear-layer features.
    # Small shapes consistent with the module (defaults scaled down):
    N_LIN, N_ATTR, N_HIDDEN, N_CLASSES = 64, 48, 32, 40

    key = jax.random.PRNGKey(0)
    kx, k1, k2, k3, k4, k5, k6 = jax.random.split(key, 7)

    def uinit(k, shape, fan_in):
        lim = 1.0 / (fan_in ** 0.5)
        return jax.random.uniform(k, shape, jnp.float32, -lim, lim)

    w_attr = uinit(k1, (N_ATTR, N_LIN), N_LIN)
    b_attr = uinit(k2, (N_ATTR,), N_LIN)
    w_int = uinit(k3, (N_HIDDEN, N_ATTR), N_ATTR)
    b_int = uinit(k4, (N_HIDDEN,), N_ATTR)
    w_fin = uinit(k5, (N_CLASSES, N_HIDDEN + N_LIN), N_HIDDEN + N_LIN)
    b_fin = uinit(k6, (N_CLASSES,), N_HIDDEN + N_LIN)

    params = prepare_params(w_attr, b_attr, w_int, b_int, w_fin, b_fin)

    # --- Test 1: default config (sigmoid bottleneck), small batch, single tile.
    B = 8
    x = jax.random.normal(kx, (B, N_LIN), dtype=jnp.float32)
    logits, concepts = cub_cbm_with_skip_head_forward(x, params)
    logits = jax.block_until_ready(logits)
    concepts = jax.block_until_ready(concepts)
    ref_logits, ref_concepts = _reference_head(
        x, w_attr, b_attr, w_int, b_int, w_fin, b_fin)
    assert logits.shape == (B, N_CLASSES)
    assert concepts.shape == (B, N_ATTR)
    assert jnp.allclose(concepts, ref_concepts, atol=1e-5, rtol=1e-5)
    assert jnp.allclose(logits, ref_logits, atol=1e-5, rtol=1e-5)

    # --- Test 2: hard (rounded) sigmoid concepts + batch split over a grid > 1.
    B2 = 24
    x2 = jax.random.normal(jax.random.PRNGKey(1), (B2, N_LIN), dtype=jnp.float32)
    logits2, concepts2 = cub_cbm_with_skip_head_forward(
        x2, params, hard=True, block_b=8)
    logits2 = jax.block_until_ready(logits2)
    concepts2 = jax.block_until_ready(concepts2)
    ref_logits2, ref_concepts2 = _reference_head(
        x2, w_attr, b_attr, w_int, b_int, w_fin, b_fin, hard=True)
    assert logits2.shape == (B2, N_CLASSES)
    assert concepts2.shape == (B2, N_ATTR)
    assert jnp.allclose(concepts2, ref_concepts2, atol=1e-5, rtol=1e-5)
    assert jnp.allclose(logits2, ref_logits2, atol=1e-5, rtol=1e-5)

    print("KERNEL_OK")
</pallas_src>

<mosaic_0001>
module attributes {stable_mosaic.version = 11 : i64} {
  func.func @_cbm_skip_head_kernel(%arg0: i32, %arg1: memref<8x128xf32, #tpu.memory_space<vmem>>, %arg2: memref<128x128xf32, #tpu.memory_space<vmem>>, %arg3: memref<1x128xf32, #tpu.memory_space<vmem>>, %arg4: memref<128x128xf32, #tpu.memory_space<vmem>>, %arg5: memref<1x128xf32, #tpu.memory_space<vmem>>, %arg6: memref<128x128xf32, #tpu.memory_space<vmem>>, %arg7: memref<128x128xf32, #tpu.memory_space<vmem>>, %arg8: memref<1x128xf32, #tpu.memory_space<vmem>>, %arg9: memref<8x128xf32, #tpu.memory_space<vmem>>, %arg10: memref<8x128xf32, #tpu.memory_space<vmem>>) attributes {dimension_semantics = [#tpu.dimension_semantics<parallel>], iteration_bounds = array<i64: 1>, scalar_prefetch = 0 : i64, scratch_operands = 0 : i64, tpu.core_type = #tpu.core_type<tc>, window_params = [{transform_indices = @transform_0, window_bounds = array<i64: 8, 128>}, {pipeline_mode = #tpu.pipeline_mode<synchronous>, transform_indices = @transform_1, window_bounds = array<i64: 128, 128>}, {pipeline_mode = #tpu.pipeline_mode<synchronous>, transform_indices = @transform_2, window_bounds = array<i64: 1, 128>}, {pipeline_mode = #tpu.pipeline_mode<synchronous>, transform_indices = @transform_3, window_bounds = array<i64: 128, 128>}, {pipeline_mode = #tpu.pipeline_mode<synchronous>, transform_indices = @transform_4, window_bounds = array<i64: 1, 128>}, {pipeline_mode = #tpu.pipeline_mode<synchronous>, transform_indices = @transform_5, window_bounds = array<i64: 128, 128>}, {pipeline_mode = #tpu.pipeline_mode<synchronous>, transform_indices = @transform_6, window_bounds = array<i64: 128, 128>}, {pipeline_mode = #tpu.pipeline_mode<synchronous>, transform_indices = @transform_7, window_bounds = array<i64: 1, 128>}, {transform_indices = @transform_8, window_bounds = array<i64: 8, 128>}, {transform_indices = @transform_9, window_bounds = array<i64: 8, 128>}]} {
    %c0 = arith.constant 0 : index
    %c0_0 = arith.constant 0 : index
    %0 = vector.load %arg1[%c0, %c0_0] : memref<8x128xf32, #tpu.memory_space<vmem>>, vector<8x128xf32>
    %cst = arith.constant 0.000000e+00 : f32
    %1 = vector.broadcast %cst : f32 to vector<8x128xf32>
    %2 = arith.maximumf %0, %1 : vector<8x128xf32>
    %c0_1 = arith.constant 0 : index
    %c0_2 = arith.constant 0 : index
    %3 = vector.load %arg2[%c0_1, %c0_2] : memref<128x128xf32, #tpu.memory_space<vmem>>, vector<128x128xf32>
    %cst_3 = arith.constant dense<0.000000e+00> : vector<8x128xf32>
    %4 = tpu.matmul %2, %3, %cst_3 {dimension_numbers = #tpu.dot_dimension_numbers<[1], [1], [0], [0], [0, 0, 1, 0], [], []>} : vector<8x128xf32>, vector<128x128xf32>, vector<8x128xf32> -> vector<8x128xf32>
    %c0_4 = arith.constant 0 : index
    %c0_5 = arith.constant 0 : index
    %5 = vector.load %arg3[%c0_4, %c0_5] : memref<1x128xf32, #tpu.memory_space<vmem>>, vector<1x128xf32>
    %6 = vector.broadcast %5 : vector<1x128xf32> to vector<8x128xf32>
    %7 = arith.addf %4, %6 : vector<8x128xf32>
    %c0_6 = arith.constant 0 : index
    %c0_7 = arith.constant 0 : index
    %8 = vector.load %arg10[%c0_6, %c0_7] : memref<8x128xf32, #tpu.memory_space<vmem>>, vector<8x128xf32>
    tpu.vector_store %arg10[%c0_6, %c0_7], %7 {strides = array<i32>} : memref<8x128xf32, #tpu.memory_space<vmem>>, vector<8x128xf32>,
    %cst_8 = arith.constant 0.000000e+00 : f32
    %9 = vector.broadcast %cst_8 : f32 to vector<8x128xf32>
    %10 = arith.subf %9, %7 : vector<8x128xf32>
    %11 = math.exp %10 : vector<8x128xf32>
    %cst_9 = arith.constant 1.000000e+00 : f32
    %12 = vector.broadcast %cst_9 : f32 to vector<8x128xf32>
    %13 = arith.addf %12, %11 : vector<8x128xf32>
    %cst_10 = arith.constant 1.000000e+00 : f32
    %14 = vector.broadcast %cst_10 : f32 to vector<8x128xf32>
    %15 = arith.divf %14, %13 : vector<8x128xf32>
    %c0_11 = arith.constant 0 : index
    %c0_12 = arith.constant 0 : index
    %16 = vector.load %arg4[%c0_11, %c0_12] : memref<128x128xf32, #tpu.memory_space<vmem>>, vector<128x128xf32>
    %cst_13 = arith.constant dense<0.000000e+00> : vector<8x128xf32>
    %17 = tpu.matmul %15, %16, %cst_13 {dimension_numbers = #tpu.dot_dimension_numbers<[1], [1], [0], [0], [0, 0, 1, 0], [], []>} : vector<8x128xf32>, vector<128x128xf32>, vector<8x128xf32> -> vector<8x128xf32>
    %c0_14 = arith.constant 0 : index
    %c0_15 = arith.constant 0 : index
    %18 = vector.load %arg5[%c0_14, %c0_15] : memref<1x128xf32, #tpu.memory_space<vmem>>, vector<1x128xf32>
    %19 = vector.broadcast %18 : vector<1x128xf32> to vector<8x128xf32>
    %20 = arith.addf %17, %19 : vector<8x128xf32>
    %cst_16 = arith.constant 0.000000e+00 : f32
    %21 = vector.broadcast %cst_16 : f32 to vector<8x128xf32>
    %22 = arith.maximumf %20, %21 : vector<8x128xf32>
    %c0_17 = arith.constant 0 : index
    %c0_18 = arith.constant 0 : index
    %23 = vector.load %arg6[%c0_17, %c0_18] : memref<128x128xf32, #tpu.memory_space<vmem>>, vector<128x128xf32>
    %cst_19 = arith.constant dense<0.000000e+00> : vector<8x128xf32>
    %24 = tpu.matmul %22, %23, %cst_19 {dimension_numbers = #tpu.dot_dimension_numbers<[1], [1], [0], [0], [0, 0, 1, 0], [], []>} : vector<8x128xf32>, vector<128x128xf32>, vector<8x128xf32> -> vector<8x128xf32>
    %c0_20 = arith.constant 0 : index
    %c0_21 = arith.constant 0 : index
    %25 = vector.load %arg7[%c0_20, %c0_21] : memref<128x128xf32, #tpu.memory_space<vmem>>, vector<128x128xf32>
    %cst_22 = arith.constant dense<0.000000e+00> : vector<8x128xf32>
    %26 = tpu.matmul %2, %25, %cst_22 {dimension_numbers = #tpu.dot_dimension_numbers<[1], [1], [0], [0], [0, 0, 1, 0], [], []>} : vector<8x128xf32>, vector<128x128xf32>, vector<8x128xf32> -> vector<8x128xf32>
    %27 = arith.addf %24, %26 : vector<8x128xf32>
    %c0_23 = arith.constant 0 : index
    %c0_24 = arith.constant 0 : index
    %28 = vector.load %arg8[%c0_23, %c0_24] : memref<1x128xf32, #tpu.memory_space<vmem>>, vector<1x128xf32>
    %29 = vector.broadcast %28 : vector<1x128xf32> to vector<8x128xf32>
    %30 = arith.addf %27, %29 : vector<8x128xf32>
    %c0_25 = arith.constant 0 : index
    %c0_26 = arith.constant 0 : index
    %31 = vector.load %arg9[%c0_25, %c0_26] : memref<8x128xf32, #tpu.memory_space<vmem>>, vector<8x128xf32>
    tpu.vector_store %arg9[%c0_25, %c0_26], %30 {strides = array<i32>} : memref<8x128xf32, #tpu.memory_space<vmem>>, vector<8x128xf32>,
    return
  }
  func.func @transform_0(%arg0: i32) -> (i32, i32) {
    %c0_i32 = arith.constant 0 : i32
    %c0_i32_0 = arith.constant 0 : i32
    return %arg0, %c0_i32 : i32, i32
  }
  func.func @transform_1(%arg0: i32) -> (i32, i32) {
    %c0_i32 = arith.constant 0 : i32
    %c0_i32_0 = arith.constant 0 : i32
    %c0_i32_1 = arith.constant 0 : i32
    return %c0_i32, %c0_i32_0 : i32, i32
  }
  func.func @transform_2(%arg0: i32) -> (i32, i32) {
    %c0_i32 = arith.constant 0 : i32
    %c0_i32_0 = arith.constant 0 : i32
    %c0_i32_1 = arith.constant 0 : i32
    return %c0_i32, %c0_i32_0 : i32, i32
  }
  func.func @transform_3(%arg0: i32) -> (i32, i32) {
    %c0_i32 = arith.constant 0 : i32
    %c0_i32_0 = arith.constant 0 : i32
    %c0_i32_1 = arith.constant 0 : i32
    return %c0_i32, %c0_i32_0 : i32, i32
  }
  func.func @transform_4(%arg0: i32) -> (i32, i32) {
    %c0_i32 = arith.constant 0 : i32
    %c0_i32_0 = arith.constant 0 : i32
    %c0_i32_1 = arith.constant 0 : i32
    return %c0_i32, %c0_i32_0 : i32, i32
  }
  func.func @transform_5(%arg0: i32) -> (i32, i32) {
    %c0_i32 = arith.constant 0 : i32
    %c0_i32_0 = arith.constant 0 : i32
    %c0_i32_1 = arith.constant 0 : i32
    return %c0_i32, %c0_i32_0 : i32, i32
  }
  func.func @transform_6(%arg0: i32) -> (i32, i32) {
    %c0_i32 = arith.constant 0 : i32
    %c0_i32_0 = arith.constant 0 : i32
    %c0_i32_1 = arith.constant 0 : i32
    return %c0_i32, %c0_i32_0 : i32, i32
  }
  func.func @transform_7(%arg0: i32) -> (i32, i32) {
    %c0_i32 = arith.constant 0 : i32
    %c0_i32_0 = arith.constant 0 : i32
    %c0_i32_1 = arith.constant 0 : i32
    return %c0_i32, %c0_i32_0 : i32, i32
  }
  func.func @transform_8(%arg0: i32) -> (i32, i32) {
    %c0_i32 = arith.constant 0 : i32
    %c0_i32_0 = arith.constant 0 : i32
    return %arg0, %c0_i32 : i32, i32
  }
  func.func @transform_9(%arg0: i32) -> (i32, i32) {
    %c0_i32 = arith.constant 0 : i32
    %c0_i32_0 = arith.constant 0 : i32
    return %arg0, %c0_i32 : i32, i32
  }
}

</mosaic_0001>

<bundles_post_ra>
// kernel: tpu_custom_call.1
= control target key start
LH: loop header
LB: loop body
LE: loop exit
PB: predicated region body
PF: predicated region fallthrough
CT: control target
= control target key end

     0   :  { %15 = vsyncpa [#allocation3], 0  ;;  %s1204_s0 = inlined_call_operand.hbm [shape: f32[8,128], index: 0, kind: input, shape index: {}]   ;;  %s1205_s1 = inlined_call_operand.hbm [shape: f32[128,128], index: 1, kind: input, shape index: {}]   ;;  %s1206_s2 = inlined_call_operand.vmem [shape: f32[1,128], index: 2, kind: input, shape index: {}]   ;;  %s1207_s3 = inlined_call_operand.hbm [shape: f32[128,128], index: 3, kind: input, shape index: {}]   ;;  %s1208_s4 = inlined_call_operand.vmem [shape: f32[1,128], index: 4, kind: input, shape index: {}]   ;;  %s1209_s5 = inlined_call_operand.hbm [shape: f32[128,128], index: 5, kind: input, shape index: {}]   ;;  %s1210_s6 = inlined_call_operand.hbm [shape: f32[128,128], index: 6, kind: input, shape index: {}]   ;;  %s1211_s7 = inlined_call_operand.vmem [shape: f32[1,128], index: 7, kind: input, shape index: {}]   ;;  %s1212_s8 = inlined_call_operand.hbm [shape: f32[8,128], index: 8, kind: output, shape index: {0}]   ;;  %s1213_s9 = inlined_call_operand.hbm [shape: f32[8,128], index: 9, kind: output, shape index: {1}]  }
   0x1   :  { %16 = vsyncpa [#allocation6], 0 }
   0x2   :  { %17 = vsyncpa [#allocation9], 0 }
   0x3   :  { %18 = vsyncpa [#allocation4], 0 }
   0x4   :  { %19 = vsyncpa [#allocation13], 0  ;;  %s994_s30 = smov [#allocation5]   ;;  %s830_s13 = scalar_lea.hbm %s1205_s1, 2048 }
   0x5   :  { %s35_s10 = sshll.u32 %s994_s30, 4  ;;  %p831_p0 = scmp.ne.s32.totalorder %s1205_s1, %s830_s13  ;;  %s36_s10 = int_to_ptr.vmem [resolvable:$true] %s35_s10 }
   0x6   :  { %p834_p1 = scmp.lt.u32.totalorder %s830_s13, %s1205_s1 }
   0x8   :  { %p836_p2 = pnand %p834_p1, %p831_p0 }
   0xa   :  { %839 = shalt.err (!%p836_p2)
}
   0xb   :  { %s840_s18 = scalar_lea.vmem %s36_s10, 2048  ;;  %p845_p4 = scmp.lt.s32.totalorder %s36_s10, %s36_s10 }
   0xc   :  { %p841_p3 = scmp.ne.s32.totalorder %s36_s10, %s840_s18  ;;  %p846_p5 = scmp.lt.s32.totalorder %s840_s18, %s840_s18 }
   0xe   :  { %p847_p6 = por %p846_p5, %p845_p4 }
  0x10   :  { %p848_p7 = pnand %p847_p6, %p841_p3 }
  0x12   :  { %851 = shalt.err (!%p848_p7)
}
  0x13   :  { %s995_s19 = smov 128   ;;  %s996_s20 = smov 8  }
  0x14   :  { %41 = dma.hbm_to_vmem [thread:$0]  %s1205_s1, 2048, %s36_s10, [#allocation6], %s995_s19, %s995_s19, %s996_s20  }
  0x15   :  { %s997_s23 = smov [#allocation8]   ;;  %s998_s25 = smov [#allocation2]  }
  0x16   :  { %s63_s24 = sshll.u32 %s997_s23, 4  ;;  %s26_s26 = sshll.u32 %s998_s25, 4  ;;  %s64_s24 = int_to_ptr.vmem [resolvable:$true] %s63_s24  ;;  %s27_s26 = int_to_ptr.vmem [resolvable:$true] %s26_s26 }
  0x17   :  { %s852_s29 = scalar_lea.hbm %s1209_s5, 2048 }
  0x18   :  { %p853_p8 = scmp.ne.s32.totalorder %s1209_s5, %s852_s29  ;;  %p856_p9 = scmp.lt.u32.totalorder %s852_s29, %s1209_s5 }
  0x1a   :  { %p858_p10 = pnand %p856_p9, %p853_p8 }
  0x1c   :  { %861 = shalt.err (!%p858_p10)
}
  0x1d   :  { %s862_s1 = scalar_lea.vmem %s64_s24, 2048  ;;  %p867_p12 = scmp.lt.s32.totalorder %s64_s24, %s64_s24 }
  0x1e   :  { %p863_p11 = scmp.ne.s32.totalorder %s64_s24, %s862_s1  ;;  %p868_p13 = scmp.lt.s32.totalorder %s862_s1, %s862_s1 }
  0x20   :  { %p869_p0 = por %p868_p13, %p867_p12 }
  0x22   :  { %p870_p1 = pnand %p869_p0, %p863_p11 }
  0x24   :  { %873 = shalt.err (!%p870_p1)
}
  0x25   :  { %69 = dma.hbm_to_vmem [thread:$0]  %s1209_s5, 2048, %s64_s24, [#allocation9], %s995_s19, %s995_s19, %s996_s20  }
  0x26   :  { %s874_s17 = scalar_lea.hbm %s1204_s0, 128 }
  0x27   :  { %p875_p2 = scmp.ne.s32.totalorder %s1204_s0, %s874_s17  ;;  %p878_p3 = scmp.lt.u32.totalorder %s874_s17, %s1204_s0 }
  0x29   :  { %p880_p4 = pnand %p878_p3, %p875_p2 }
  0x2b   :  { %883 = shalt.err (!%p880_p4)
}
  0x2c   :  { %s884_s25 = scalar_lea.vmem %s27_s26, 128  ;;  %p889_p6 = scmp.lt.s32.totalorder %s27_s26, %s27_s26 }
  0x2d   :  { %p885_p5 = scmp.ne.s32.totalorder %s27_s26, %s884_s25  ;;  %p890_p7 = scmp.lt.s32.totalorder %s884_s25, %s884_s25 }
  0x2f   :  { %p891_p8 = por %p890_p7, %p889_p6 }
  0x31   :  { %p892_p9 = pnand %p891_p8, %p885_p5 }
  0x33   :  { %895 = shalt.err (!%p892_p9)
}
  0x34   :  { %29 = dma.hbm_to_vmem [thread:$0]  %s1204_s0, 128, %s27_s26, [#allocation3]  }
  0x35   :  { %s999_s27 = smov [#allocation7]   ;;  %s1000_s29 = smov [#allocation10]  }
  0x36   :  { %s49_s28 = sshll.u32 %s999_s27, 4  ;;  %s75_s30 = sshll.u32 %s1000_s29, 4  ;;  %s50_s28 = int_to_ptr.vmem [resolvable:$true] %s49_s28  ;;  %s76_s30 = int_to_ptr.vmem [resolvable:$true] %s75_s30 }
  0x37   :  { %s896_s13 = scalar_lea.hbm %s1207_s3, 2048 }
  0x38   :  { %p897_p10 = scmp.ne.s32.totalorder %s1207_s3, %s896_s13  ;;  %p900_p11 = scmp.lt.u32.totalorder %s896_s13, %s1207_s3 }
  0x3a   :  { %p902_p12 = pnand %p900_p11, %p897_p10 }
  0x3c   :  { %905 = shalt.err (!%p902_p12)
}
  0x3d   :  { %s906_s0 = scalar_lea.vmem %s50_s28, 2048  ;;  %p911_p0 = scmp.lt.s32.totalorder %s50_s28, %s50_s28 }
  0x3e   :  { %p907_p13 = scmp.ne.s32.totalorder %s50_s28, %s906_s0  ;;  %p912_p1 = scmp.lt.s32.totalorder %s906_s0, %s906_s0 }
  0x40   :  { %p913_p2 = por %p912_p1, %p911_p0 }
  0x42   :  { %p914_p3 = pnand %p913_p2, %p907_p13 }
  0x44   :  { %917 = shalt.err (!%p914_p3)
}
  0x45   :  { %55 = dma.hbm_to_vmem [thread:$0]  %s1207_s3, 2048, %s50_s28, [#allocation6], %s995_s19, %s995_s19, %s996_s20  }
  0x46   :  { %s918_s21 = scalar_lea.hbm %s1210_s6, 2048 }
  0x47   :  { %p919_p4 = scmp.ne.s32.totalorder %s1210_s6, %s918_s21  ;;  %p922_p5 = scmp.lt.u32.totalorder %s918_s21, %s1210_s6 }
  0x49   :  { %p924_p6 = pnand %p922_p5, %p919_p4 }
  0x4b   :  { %927 = shalt.err (!%p924_p6)
}
  0x4c   :  { %s928_s24 = scalar_lea.vmem %s76_s30, 2048  ;;  %p933_p8 = scmp.lt.s32.totalorder %s76_s30, %s76_s30 }
  0x4d   :  { %p929_p7 = scmp.ne.s32.totalorder %s76_s30, %s928_s24  ;;  %p934_p9 = scmp.lt.s32.totalorder %s928_s24, %s928_s24 }
  0x4f   :  { %p935_p10 = por %p934_p9, %p933_p8 }
  0x51   :  { %p936_p11 = pnand %p935_p10, %p929_p7 }
  0x53   :  { %939 = shalt.err (!%p936_p11)
}
  0x54   :  { %81 = dma.hbm_to_vmem [thread:$0]  %s1210_s6, 2048, %s76_s30, [#allocation9], %s995_s19, %s995_s19, %s996_s20  }
  0x55   :  { %984 = dma.done.wait [#allocation3], 128  }
  0x56   :  { %985 = vsyncadd [#allocation3], 4294967168 }
  0x57   :  { %986 = dma.done.wait [#allocation6], 4096  }
  0x58   :  { %987 = vsyncadd [#allocation6], 4294963200 }
  0x59   :  { %988 = dma.done.wait [#allocation9], 4096  }
  0x5a   :  { %989 = vsyncadd [#allocation9], 4294963200  ;;  %v1001_v0 = vmov 0.0|0.0   ;;  %vm1002_vm0 = vmmov 0   ;;  %v1003_v1 = vmov 0.0   ;;  %v101_v2 = vld [vmem:[#allocation5] sm:$0xff] }
  0x5b   :  { %718 = vmatprep.subr.bf16.mxu0 %v1001_v0  ;;  %610 = vmatprep.mubr.msk.f32.mxu0 %vm1002_vm0, %v1003_v1  ;;  %v102_v3 = vld [vmem:[#allocation5 + $0x8] sm:$0xff]  ;;  %v103_v5 = vld [vmem:[#allocation5 + $0x10] sm:$0xff]  ;;  %v104_v6 = vld [vmem:[#allocation5 + $0x18] sm:$0xff]  ;;  %s1004_s28 = smov [#allocation12]  }
  0x5c   :  { %742 = vmatprep.subr.bf16.mxu1 %v1001_v0  ;;  %645 = vmatprep.mubr.msk.f32.mxu1 %vm1002_vm0, %v1003_v1  ;;  %v719_v4 = vpack.c.bf16 %v102_v3, %v101_v2  ;;  %v201_v7 = vld [vmem:[#allocation7] sm:$0xff]  ;;  %v202_v8 = vld [vmem:[#allocation7 + $0x8] sm:$0xff]  ;;  %v722_v9 = vpack.c.bf16 %v104_v6, %v103_v5  ;;  %v203_v11 = vld [vmem:[#allocation7 + $0x10] sm:$0xff]  ;;  %s492_s29 = sshll.u32 %s1004_s28, 4  ;;  %s493_s29 = int_to_ptr.vmem [resolvable:$true] %s492_s29 }
  0x5d   :  { %v743_v10 = vpack.c.bf16 %v202_v8, %v201_v7  ;;  %v204_v12 = vld [vmem:[#allocation7 + $0x18] sm:$0xff]  ;;  %v105_v13 = vld [vmem:[#allocation5 + $0x20] sm:$0xff]  ;;  %v106_v14 = vld [vmem:[#allocation5 + $0x28] sm:$0xff]  ;;  %s940_s30 = scalar_lea.vmem %s493_s29, 128  ;;  %p945_p13 = scmp.lt.s32.totalorder %s493_s29, %s493_s29 }
  0x5e   :  { %720 = vmatpush3.bf16.xpose.msra.mxu0 %v719_v4  ;;  %v746_v15 = vpack.c.bf16 %v204_v12, %v203_v11  ;;  %v725_v16 = vpack.c.bf16 %v106_v14, %v105_v13  ;;  %v205_v17 = vld [vmem:[#allocation7 + $0x20] sm:$0xff]  ;;  %v206_v18 = vld [vmem:[#allocation7 + $0x28] sm:$0xff]  ;;  %v107_v19 = vld [vmem:[#allocation5 + $0x30] sm:$0xff]  ;;  %p941_p12 = scmp.ne.s32.totalorder %s493_s29, %s940_s30  ;;  %p946_p0 = scmp.lt.s32.totalorder %s940_s30, %s940_s30 }
  0x5f   :  { %721 = vmatprep.subr.bf16.mxu0 %v1001_v0  ;;  %744 = vmatpush3.bf16.xpose.msra.mxu1 %v743_v10  ;;  %v108_v20 = vld [vmem:[#allocation5 + $0x38] sm:$0xff]  ;;  %v749_v21 = vpack.c.bf16 %v206_v18, %v205_v17  ;;  %v207_v23 = vld [vmem:[#allocation7 + $0x30] sm:$0xff]  ;;  %v109_v25 = vld [vmem:[#allocation5 + $0x40] sm:$0xff] }
  0x60   :  { %745 = vmatprep.subr.bf16.mxu1 %v1001_v0  ;;  %v728_v22 = vpack.c.bf16 %v108_v20, %v107_v19  ;;  %v208_v24 = vld [vmem:[#allocation7 + $0x38] sm:$0xff]  ;;  %v110_v26 = vld [vmem:[#allocation5 + $0x48] sm:$0xff]  ;;  %v111_v29 = vld [vmem:[#allocation5 + $0x50] sm:$0xff]  ;;  %p947_p1 = por %p946_p0, %p945_p13 }
  0x61   :  { %v752_v27 = vpack.c.bf16 %v208_v24, %v207_v23  ;;  %v731_v28 = vpack.c.bf16 %v110_v26, %v109_v25  ;;  %v112_v30 = vld [vmem:[#allocation5 + $0x58] sm:$0xff]  ;;  %v113_v32 = vld [vmem:[#allocation5 + $0x60] sm:$0xff]  ;;  %v114_v33 = vld [vmem:[#allocation5 + $0x68] sm:$0xff] }
  0x62   :  { %v734_v31 = vpack.c.bf16 %v112_v30, %v111_v29  ;;  %v737_v34 = vpack.c.bf16 %v114_v33, %v113_v32  ;;  %v115_v35 = vld [vmem:[#allocation5 + $0x70] sm:$0xff]  ;;  %v116_v36 = vld [vmem:[#allocation5 + $0x78] sm:$0xff]  ;;  %v209_v40 = vld [vmem:[#allocation7 + $0x40] sm:$0xff]  ;;  %p948_p2 = pnand %p947_p1, %p941_p12 }
  0x63   :  { %v740_v37 = vpack.c.bf16 %v116_v36, %v115_v35  ;;  %v1145_v38 = vld [vmem:[#allocation2] sm:$0xff]  ;;  %v210_v41 = vld [vmem:[#allocation7 + $0x48] sm:$0xff]  ;;  %v211_v43 = vld [vmem:[#allocation7 + $0x50] sm:$0xff] }
  0x64   :  { %v100_v39 = vmax.f32 %v1145_v38, 0.0  ;;  %v755_v42 = vpack.c.bf16 %v210_v41, %v209_v40  ;;  %v212_v44 = vld [vmem:[#allocation7 + $0x58] sm:$0xff]  ;;  %v213_v46 = vld [vmem:[#allocation7 + $0x60] sm:$0xff]  ;;  %v214_v47 = vld [vmem:[#allocation7 + $0x68] sm:$0xff] }
  0x65   :  { %v758_v45 = vpack.c.bf16 %v212_v44, %v211_v43  ;;  %v761_v48 = vpack.c.bf16 %v214_v47, %v213_v46  ;;  %v215_v49 = vld [vmem:[#allocation7 + $0x70] sm:$0xff]  ;;  %v216_v50 = vld [vmem:[#allocation7 + $0x78] sm:$0xff]  ;;  %v311_v52 = vld [vmem:[#allocation10] sm:$0xff] }
  0x66   :  { %723 = vmatpush3.bf16.xpose.msra.mxu0 %v722_v9  ;;  %v764_v51 = vpack.c.bf16 %v216_v50, %v215_v49  ;;  %v312_v53 = vld [vmem:[#allocation10 + $0x8] sm:$0xff]  ;;  %v313_v55 = vld [vmem:[#allocation10 + $0x10] sm:$0xff]  ;;  %v314_v56 = vld [vmem:[#allocation10 + $0x18] sm:$0xff] }
  0x67   :  { %724 = vmatprep.subr.bf16.mxu0 %v1001_v0  ;;  %747 = vmatpush3.bf16.xpose.msra.mxu1 %v746_v15  ;;  %v767_v54 = vpack.c.bf16 %v312_v53, %v311_v52  ;;  %v770_v57 = vpack.c.bf16 %v314_v56, %v313_v55  ;;  %v315_v58 = vld [vmem:[#allocation10 + $0x20] sm:$0xff]  ;;  %v316_v59 = vld [vmem:[#allocation10 + $0x28] sm:$0xff]  ;;  %v317_v61 = vld [vmem:[#allocation10 + $0x30] sm:$0xff] }
  0x68   :  { %748 = vmatprep.subr.bf16.mxu1 %v1001_v0  ;;  %v773_v60 = vpack.c.bf16 %v316_v59, %v315_v58  ;;  %v318_v62 = vld [vmem:[#allocation10 + $0x38] sm:$0xff]  ;;  %v319_v2 = vld [vmem:[#allocation10 + $0x40] sm:$0xff]  ;;  %v320_v3 = vld [vmem:[#allocation10 + $0x48] sm:$0xff] }
  0x69   :  { %v776_v63 = vpack.c.bf16 %v318_v62, %v317_v61  ;;  %v779_v4 = vpack.c.bf16 %v320_v3, %v319_v2  ;;  %v321_v5 = vld [vmem:[#allocation10 + $0x50] sm:$0xff]  ;;  %v322_v6 = vld [vmem:[#allocation10 + $0x58] sm:$0xff]  ;;  %v323_v8 = vld [vmem:[#allocation10 + $0x60] sm:$0xff] }
  0x6a   :  { %v782_v7 = vpack.c.bf16 %v322_v6, %v321_v5  ;;  %v324_v9 = vld [vmem:[#allocation10 + $0x68] sm:$0xff]  ;;  %v325_v11 = vld [vmem:[#allocation10 + $0x70] sm:$0xff]  ;;  %v326_v12 = vld [vmem:[#allocation10 + $0x78] sm:$0xff] }
  0x6b   :  { %v785_v10 = vpack.c.bf16 %v324_v9, %v323_v8  ;;  %v788_v13 = vpack.c.bf16 %v326_v12, %v325_v11  ;;  %v507_v14 = vld [vmem:[%s1206_s2] ss:$0 sm:$0xff]  ;;  %v296_v23 = vld [vmem:[#allocation8 + $0x8] sm:$0xff]  ;;  %v297_v26 = vld [vmem:[#allocation8 + $0x10] sm:$0xff] }
  0x6c   :  { %v299_v29 = vld [vmem:[#allocation8 + $0x20] sm:$0xff]  ;;  %v300_v30 = vld [vmem:[#allocation8 + $0x28] sm:$0xff]  ;;  %v301_v32 = vld [vmem:[#allocation8 + $0x30] sm:$0xff] }
  0x6d   :  { %v302_v33 = vld [vmem:[#allocation8 + $0x38] sm:$0xff]  ;;  %v304_v35 = vld [vmem:[#allocation8 + $0x48] sm:$0xff]  ;;  %v307_v40 = vld [vmem:[#allocation8 + $0x60] sm:$0xff] }
  0x6e   :  { %726 = vmatpush3.bf16.xpose.msra.mxu0 %v725_v16  ;;  %v306_v38 = vld [vmem:[#allocation8 + $0x58] sm:$0xff]  ;;  %v308_v41 = vld [vmem:[#allocation8 + $0x68] sm:$0xff]  ;;  %v309_v43 = vld [vmem:[#allocation8 + $0x70] sm:$0xff] }
  0x6f   :  { %727 = vmatprep.subr.bf16.mxu0 %v1001_v0  ;;  %750 = vmatpush3.bf16.xpose.msra.mxu1 %v749_v21  ;;  %v310_v44 = vld [vmem:[#allocation8 + $0x78] sm:$0xff] }
  0x70   :  { %751 = vmatprep.subr.bf16.mxu1 %v1001_v0 }
  0x76   :  { %729 = vmatpush3.bf16.xpose.msra.mxu0 %v728_v22  ;;  %v295_v22 = vld [vmem:[#allocation8] sm:$0xff] }
  0x77   :  { %730 = vmatprep.subr.bf16.mxu0 %v1001_v0  ;;  %753 = vmatpush3.bf16.xpose.msra.mxu1 %v752_v27  ;;  %v791_v24 = vpack.c.bf16 %v296_v23, %v295_v22  ;;  %v298_v27 = vld [vmem:[#allocation8 + $0x18] sm:$0xff] }
  0x78   :  { %754 = vmatprep.subr.bf16.mxu1 %v1001_v0 }
  0x7e   :  { %732 = vmatpush3.bf16.xpose.msra.mxu0 %v731_v28  ;;  %v794_v28 = vpack.c.bf16 %v298_v27, %v297_v26 }
  0x7f   :  { %733 = vmatprep.subr.bf16.mxu0 %v1001_v0  ;;  %756 = vmatpush3.bf16.xpose.msra.mxu1 %v755_v42  ;;  %v809_v42 = vpack.c.bf16 %v308_v41, %v307_v40 }
  0x80   :  { %757 = vmatprep.subr.bf16.mxu1 %v1001_v0 }
  0x86   :  { %735 = vmatpush3.bf16.xpose.msra.mxu0 %v734_v31  ;;  %v797_v31 = vpack.c.bf16 %v300_v30, %v299_v29 }
  0x87   :  { %736 = vmatprep.subr.bf16.mxu0 %v1001_v0  ;;  %759 = vmatpush3.bf16.xpose.msra.mxu1 %v758_v45  ;;  %v812_v45 = vpack.c.bf16 %v310_v44, %v309_v43 }
  0x88   :  { %760 = vmatprep.subr.bf16.mxu1 %v1001_v0 }
  0x8e   :  { %738 = vmatpush3.bf16.xpose.msra.mxu0 %v737_v34  ;;  %v800_v34 = vpack.c.bf16 %v302_v33, %v301_v32 }
  0x8f   :  { %739 = vmatprep.subr.bf16.mxu0 %v1001_v0  ;;  %762 = vmatpush3.bf16.xpose.msra.mxu1 %v761_v48  ;;  %v508_v48 = vld [vmem:[%s1208_s4] ss:$0 sm:$0xff] }
  0x90   :  { %763 = vmatprep.subr.bf16.mxu1 %v1001_v0 }
  0x96   :  { %741 = vmatpush3.bf16.xpose.msra.mxu0 %v740_v37  ;;  %v305_v37 = vld [vmem:[#allocation8 + $0x50] sm:$0xff] }
  0x97   :  { %766 = vmatprep.subr.bf16.mxu0 %v1001_v0  ;;  %765 = vmatpush3.bf16.xpose.msra.mxu1 %v764_v51 }
  0x98   :  { %790 = vmatprep.subr.bf16.mxu1 %v1001_v0 }
  0x9d   :  { %611 = vmatmul.mubr.f32.vlgmr.msra.gmra.mrb[0].mxu0 %v100_v39 }
  0x9e   :  { %680 = vmatprep.mubr.msk.f32.mxu0 %vm1002_vm0, %v1003_v1  ;;  %768 = vmatpush3.bf16.xpose.msra.mxu0 %v767_v54 }
  0x9f   :  { %769 = vmatprep.subr.bf16.mxu0 %v1001_v0 }
  0xa6   :  { %771 = vmatpush3.bf16.xpose.msra.mxu0 %v770_v57 }
  0xa7   :  { %772 = vmatprep.subr.bf16.mxu0 %v1001_v0 }
  0xae   :  { %774 = vmatpush3.bf16.xpose.msra.mxu0 %v773_v60 }
  0xaf   :  { %775 = vmatprep.subr.bf16.mxu0 %v1001_v0 }
  0xb6   :  { %777 = vmatpush3.bf16.xpose.msra.mxu0 %v776_v63 }
  0xb7   :  { %778 = vmatprep.subr.bf16.mxu0 %v1001_v0 }
  0xbe   :  { %780 = vmatpush3.bf16.xpose.msra.mxu0 %v779_v4 }
  0xbf   :  { %781 = vmatprep.subr.bf16.mxu0 %v1001_v0 }
  0xc6   :  { %783 = vmatpush3.bf16.xpose.msra.mxu0 %v782_v7 }
  0xc7   :  { %784 = vmatprep.subr.bf16.mxu0 %v1001_v0 }
  0xce   :  { %786 = vmatpush3.bf16.xpose.msra.mxu0 %v785_v10 }
  0xcf   :  { %787 = vmatprep.subr.bf16.mxu0 %v1001_v0 }
  0xd6   :  { %789 = vmatpush3.bf16.xpose.msra.mxu0 %v788_v13 }
  0xdd   :  { %681 = vmatmul.mubr.f32.vlgmr.msra.gmra.mrb[2].mxu0 %v100_v39  ;;  %v806_v39 = vpack.c.bf16 %v306_v38, %v305_v37 }
 0x170   :  { %v190_v15 = vpop.f32.mrb[0].mxu0 }
 0x171   :  { %v191_v16 = vadd.f32 %v507_v14, %v190_v15  ;;  %v612_v17 = vpop.f32.mrb[1].mxu0 }
 0x173   :  { %v195_v18 = vsub.f32 0.0, %v191_v16  ;;  %194 = vst [vmem:[#allocation12] sm:$0xff] %v191_v16 }
 0x175   :  { %v196_v19 = vmul.f32 1.442695, %v195_v18 }
 0x177   :  { %826 = vpow2.f32 %v196_v19 }
 0x181   :  { %v827_v20 = vpop.eup %826 }
 0x182   :  { %v198_v21 = vadd.f32 1.0, %v827_v20 }
 0x184   :  { %828 = vrcp.f32 %v198_v21 }
 0x18e   :  { %v829_v25 = vpop.eup %828 }
 0x18f   :  { %646 = vmatmul.mubr.f32.vlgmr.msra.gmra.mrb[0].mxu1 %v829_v25 }
 0x190   :  { %792 = vmatpush3.bf16.xpose.msra.mxu1 %v791_v24  ;;  %715 = vmatprep.mubr.msk.f32.mxu1 %vm1002_vm0, %v1003_v1  ;;  %v303_v1 = vld [vmem:[#allocation8 + $0x40] sm:$0xff] }
 0x191   :  { %793 = vmatprep.subr.bf16.mxu1 %v1001_v0  ;;  %v803_v36 = vpack.c.bf16 %v304_v35, %v303_v1 }
 0x198   :  { %795 = vmatpush3.bf16.xpose.msra.mxu1 %v794_v28 }
 0x199   :  { %796 = vmatprep.subr.bf16.mxu1 %v1001_v0 }
 0x1a0   :  { %798 = vmatpush3.bf16.xpose.msra.mxu1 %v797_v31 }
 0x1a1   :  { %799 = vmatprep.subr.bf16.mxu1 %v1001_v0 }
 0x1a8   :  { %801 = vmatpush3.bf16.xpose.msra.mxu1 %v800_v34 }
 0x1a9   :  { %802 = vmatprep.subr.bf16.mxu1 %v1001_v0 }
 0x1b0   :  { %804 = vmatpush3.bf16.xpose.msra.mxu1 %v803_v36  ;;  %v393_v46 = vpop.f32.mrb[2].mxu0 }
 0x1b1   :  { %805 = vmatprep.subr.bf16.mxu1 %v1001_v0  ;;  %v682_v47 = vpop.f32.mrb[3].mxu0 }
 0x1b8   :  { %807 = vmatpush3.bf16.xpose.msra.mxu1 %v806_v39 }
 0x1b9   :  { %808 = vmatprep.subr.bf16.mxu1 %v1001_v0 }
 0x1c0   :  { %810 = vmatpush3.bf16.xpose.msra.mxu1 %v809_v42 }
 0x1c1   :  { %811 = vmatprep.subr.bf16.mxu1 %v1001_v0 }
 0x1c8   :  { %813 = vmatpush3.bf16.xpose.msra.mxu1 %v812_v45 }
 0x262   :  { %v290_v49 = vpop.f32.mrb[0].mxu1 }
 0x263   :  { %v291_v50 = vadd.f32 %v508_v48, %v290_v49  ;;  %v647_v51 = vpop.f32.mrb[1].mxu1 }
 0x265   :  { %v294_v52 = vmax.f32 %v291_v50, 0.0 }
 0x267   :  { %716 = vmatmul.mubr.f32.vlgmr.msra.gmra.mrb[2].mxu1 %v294_v52 }
 0x268   :  { %951 = shalt.err (!%p948_p2)
}
 0x269   :  { %s952_s13 = scalar_lea.hbm %s1213_s9, 128 }
 0x26a   :  { %p953_p3 = scmp.ne.s32.totalorder %s1213_s9, %s952_s13  ;;  %p956_p4 = scmp.lt.u32.totalorder %s952_s13, %s1213_s9 }
 0x26c   :  { %p958_p5 = pnand %p956_p4, %p953_p3 }
 0x26e   :  { %961 = shalt.err (!%p958_p5)
}
 0x26f   :  { %495 = dma.vmem_to_hbm [thread:$0]  %s493_s29, 128, %s1213_s9, [#allocation13]   ;;  %v509_v53 = vld [vmem:[%s1211_s7] ss:$0 sm:$0xff] }
 0x270   :  { %s1005_s17 = smov [#allocation11]  }
 0x271   :  { %s482_s18 = sshll.u32 %s1005_s17, 4  ;;  %s483_s18 = int_to_ptr.vmem [resolvable:$true] %s482_s18 }
 0x272   :  { %s962_s21 = scalar_lea.vmem %s483_s18, 128  ;;  %p967_p7 = scmp.lt.s32.totalorder %s483_s18, %s483_s18 }
 0x273   :  { %p963_p6 = scmp.ne.s32.totalorder %s483_s18, %s962_s21  ;;  %p968_p8 = scmp.lt.s32.totalorder %s962_s21, %s962_s21 }
 0x275   :  { %p969_p9 = por %p968_p8, %p967_p7 }
 0x277   :  { %p970_p10 = pnand %p969_p9, %p963_p6 }
 0x33a   :  { %v463_v0 = vpop.f32.mrb[2].mxu1 }
 0x33b   :  { %v464_v54 = vadd.f32 %v463_v0, %v393_v46  ;;  %v717_v55 = vpop.f32.mrb[3].mxu1 }
 0x33d   :  { %v474_v56 = vadd.f32 %v509_v53, %v464_v54 }
 0x33f   :  { %475 = vst [vmem:[#allocation11] sm:$0xff] %v474_v56 }
 0x340   :  { %973 = shalt.err (!%p970_p10)
}
 0x341   :  { %s974_s23 = scalar_lea.hbm %s1212_s8, 128 }
 0x342   :  { %p975_p11 = scmp.ne.s32.totalorder %s1212_s8, %s974_s23  ;;  %p978_p12 = scmp.lt.u32.totalorder %s974_s23, %s1212_s8 }
 0x344   :  { %p980_p13 = pnand %p978_p12, %p975_p11 }
 0x346   :  { %983 = shalt.err (!%p980_p13)
}
 0x347   :  { %485 = dma.vmem_to_hbm [thread:$0]  %s483_s18, 128, %s1212_s8, [#allocation4]  }
 0x348   :  { %990 = dma.done.wait [#allocation4], 128  }
 0x349   :  { %991 = vsyncadd [#allocation4], 4294967168 }
 0x34a   :  { %992 = dma.done.wait [#allocation13], 128  }
 0x34b   :  { %993 = vsyncadd [#allocation13], 4294967168 }
 0x34c   :  { %502 = vsyncpa [#allocation3], 1 }
 0x34d   :  { %503 = vsyncpa [#allocation6], 1 }
 0x34e   :  { %504 = vsyncpa [#allocation9], 1 }
 0x34f   :  { %505 = vsyncpa [#allocation4], 1 }
 0x350   :  { %506 = vsyncpa [#allocation13], 1 }

</bundles_post_ra>
